<compile_context>
chip_gen: v7x
topology: tpu7x:2x2x1
jax: 0.10.0
libtpu: 0.0.40
codegen_flags: <defaults>
</compile_context>

<pallas_src>
import jax
import jax.numpy as jnp
from jax.experimental import pallas as pl
from jax.experimental.pallas import tpu as pltpu


def _round_up(a, b):
    return (a + b - 1) // b * b


def _vmem_capacity_bytes():
    """Physical per-core VMEM; conservative fallback = smallest (v7x, 64 MiB)."""
    try:
        return int(pltpu.get_tpu_info().vmem_capacity_bytes)
    except Exception:
        return 64 * 1024 * 1024


def _second_matmul_operand(h, w2_dtype):
    # Guard: only downcast the f32 intermediate to a >=16-bit float MXU dtype.
    if jnp.issubdtype(w2_dtype, jnp.floating) and jnp.dtype(w2_dtype).itemsize >= 2:
        return h.astype(w2_dtype)
    return h  # keep f32 for exotic weight dtypes (int8 / fp8) rather than quantizing h


def _ffn_partial(x_ref, w1_ref, b1_ref, w2_ref):
    """relu(x @ w1 + b1) @ w2 for the current d_ff tile, f32 result."""
    h = jnp.dot(x_ref[...], w1_ref[...], preferred_element_type=jnp.float32)
    h = jnp.maximum(h + b1_ref[...].astype(jnp.float32), 0.0)  # ReLU
    # TODO(synk): dropout omitted (eval-mode identity); a training-mode kernel
    # would use pltpu.prng_seed / pltpu.prng_random_bits here with 1/(1-p) scaling.
    return jnp.dot(_second_matmul_operand(h, w2_ref.dtype), w2_ref[...],
                   preferred_element_type=jnp.float32)


def ffn_kernel_out_acc(x_ref, w1_ref, b1_ref, w2_ref, b2_ref, o_ref):
    """f32 output: accumulate directly into the resident output tile (no scratch)."""
    f = pl.program_id(1)

    @pl.when(f == 0)
    def _():
        # Fold b2 into the accumulator init (adding it per d_ff tile would be wrong).
        o_ref[...] = jnp.broadcast_to(b2_ref[...].astype(o_ref.dtype), o_ref.shape)

    o_ref[...] += _ffn_partial(x_ref, w1_ref, b1_ref, w2_ref)


def ffn_kernel_scratch_acc(x_ref, w1_ref, b1_ref, w2_ref, b2_ref, o_ref, acc_ref):
    """Non-f32 output: f32 VMEM scratch accumulator, cast once on the last f step."""
    f = pl.program_id(1)

    @pl.when(f == 0)
    def _():
        acc_ref[...] = jnp.broadcast_to(b2_ref[...].astype(jnp.float32), acc_ref.shape)

    acc_ref[...] += _ffn_partial(x_ref, w1_ref, b1_ref, w2_ref)

    @pl.when(f == pl.num_programs(1) - 1)
    def _():
        o_ref[...] = acc_ref[...].astype(o_ref.dtype)


def feed_forward(x, w1, b1, w2, b2, *, tm=None, tf=None, compute_dtype=None,
                 weight_buffers=2):
    """x: (B, S, d_model). w1: (d_model, d_ff) (transposed vs. torch Linear.weight),
    b1: (d_ff,), w2: (d_ff, d_model), b2: (d_model,).
    compute_dtype: optional (e.g. jnp.bfloat16) to run both matmuls on the
    full-rate MXU path with f32 accumulation; output keeps x.dtype."""
    B, S, d_model = x.shape
    d_ff = w1.shape[1]
    M = B * S

    out_dtype = x.dtype
    x2 = x.reshape(M, d_model)
    if compute_dtype is not None:
        x2 = x2.astype(compute_dtype)
        w1 = w1.astype(compute_dtype)
        w2 = w2.astype(compute_dtype)

    x_itemsize = jnp.dtype(x2.dtype).itemsize
    w_itemsize = jnp.dtype(w1.dtype).itemsize
    out_itemsize = jnp.dtype(out_dtype).itemsize

    # --- generation-aware tile targets (from VMEM capacity) -----------------
    vmem_cap = _vmem_capacity_bytes()
    big_vmem = vmem_cap >= 96 * 1024 * 1024        # v5e/v6e (128 MiB) vs v7x (64 MiB)
    if tm is None:
        tm = 1024 if big_vmem else 512
    if tf is None:
        tf = 2048 if big_vmem else 1024            # multiples of 256 (MXU width)

    use_scratch = out_dtype != jnp.float32

    # --- row tile ------------------------------------------------------------
    # (bf16 sublane packing needs multiples of 16, f32 needs 8.)
    row_align = 16 if x_itemsize < 4 else 8
    tm_eff = _round_up(min(tm, _round_up(M, row_align)), row_align)
    # keep row-padding waste under ~25% of the padded extent
    while tm_eff > row_align and (_round_up(M, tm_eff) - M) * 4 > _round_up(M, tm_eff):
        tm_eff = max(row_align, _round_up(tm_eff // 2, row_align))

    # --- d_ff (reduction) tile -------------------------------------------------
    if d_ff <= tf:
        tf_eff = d_ff                              # take d_ff whole if it fits
    else:
        tf_eff = _round_up(min(tf, d_ff), 256)

    # --- shrink tiles until they fit the scoped-VMEM budget --------------------
    def vmem_estimate(tm_e, tf_e):
        est = 2 * (tm_e * d_model * x_itemsize       # x tile (double-buffered)
                   + d_model * tf_e * w_itemsize     # w1 tile
                   + tf_e * w_itemsize               # b1 tile
                   + tf_e * d_model * w_itemsize     # w2 tile
                   + d_model * w_itemsize            # b2
                   + tm_e * d_model * out_itemsize)  # out tile
        if use_scratch:
            est += tm_e * d_model * 4                # f32 accumulator scratch
        return est

    vmem_ceiling = int(vmem_cap * 0.82)              # ~105 MiB of 128, ~52 MiB of 64
    while vmem_estimate(tm_eff, tf_eff) > vmem_ceiling:
        if tm_eff > 256:
            tm_eff = max(256, _round_up(tm_eff // 2, row_align))
        elif tf_eff > 256:
            tf_eff = max(256, _round_up(tf_eff // 2, 256))
        elif tm_eff > row_align:
            tm_eff = max(row_align, _round_up(tm_eff // 2, row_align))
        else:
            break

    M_pad = _round_up(M, tm_eff)
    if d_ff <= tf_eff:
        tf_eff = d_ff
        d_ff_pad = d_ff
    else:
        d_ff_pad = _round_up(d_ff, tf_eff)

    # --- pad operands (zero padding is exact) ----------------------------------
    if M_pad != M:
        x2 = jnp.pad(x2, ((0, M_pad - M), (0, 0)))
    w1_p = w1 if d_ff_pad == d_ff else jnp.pad(w1, ((0, 0), (0, d_ff_pad - d_ff)))
    b1_p = b1 if d_ff_pad == d_ff else jnp.pad(b1, (0, d_ff_pad - d_ff))
    w2_p = w2 if d_ff_pad == d_ff else jnp.pad(w2, ((0, d_ff_pad - d_ff), (0, 0)))
    b1_2 = b1_p.reshape(1, d_ff_pad)
    b2_2 = b2.reshape(1, d_model)

    grid = (M_pad // tm_eff, d_ff_pad // tf_eff)
    n_row_tiles = grid[0]

    # --- VMEM limit: per-generation, always covers the kernel's own tiles -------
    vmem_est = vmem_estimate(tm_eff, tf_eff)
    vmem_limit = int(min(vmem_cap * 0.9, max(32 * 1024 * 1024, vmem_est * 1.3)))
    vmem_limit = max(vmem_limit, int(vmem_est * 1.1))

    # --- advisory cost: weights are re-streamed once per row tile ---------------
    cost = pl.CostEstimate(
        flops=4 * M_pad * d_model * d_ff_pad,                     # two matmuls
        transcendentals=0,
        bytes_accessed=(M_pad * d_model * (x_itemsize + out_itemsize)   # x in + out
                        + n_row_tiles * (2 * d_model * d_ff_pad * w_itemsize  # w1+w2
                                         + d_ff_pad * w_itemsize           # b1
                                         + d_model * w_itemsize)),          # b2
    )

    # Optional third weight buffer (enable only if profile shows exposed DMA waits).
    if weight_buffers and weight_buffers > 2:
        w1_spec = pl.BlockSpec((d_model, tf_eff), lambda i, f: (0, f),
                               pipeline_mode=pl.Buffered(weight_buffers))
        w2_spec = pl.BlockSpec((tf_eff, d_model), lambda i, f: (f, 0),
                               pipeline_mode=pl.Buffered(weight_buffers))
    else:
        w1_spec = pl.BlockSpec((d_model, tf_eff), lambda i, f: (0, f))
        w2_spec = pl.BlockSpec((tf_eff, d_model), lambda i, f: (f, 0))

    if use_scratch:
        kernel = ffn_kernel_scratch_acc
        scratch_shapes = [pltpu.VMEM((tm_eff, d_model), jnp.float32)]
    else:
        kernel = ffn_kernel_out_acc            # accumulate directly in o_ref (f32)
        scratch_shapes = []

    out = pl.pallas_call(
        kernel,
        out_shape=jax.ShapeDtypeStruct((M_pad, d_model), out_dtype),
        grid_spec=pltpu.PrefetchScalarGridSpec(
            num_scalar_prefetch=0,
            grid=grid,
            in_specs=[
                pl.BlockSpec((tm_eff, d_model), lambda i, f: (i, 0)),   # x tile
                w1_spec,                                                 # w1 tile
                pl.BlockSpec((1, tf_eff), lambda i, f: (0, f)),          # b1 tile
                w2_spec,                                                 # w2 tile
                pl.BlockSpec((1, d_model), lambda i, f: (0, 0)),         # b2
            ],
            out_specs=pl.BlockSpec((tm_eff, d_model), lambda i, f: (i, 0)),
            scratch_shapes=scratch_shapes,
        ),
        compiler_params=pltpu.CompilerParams(
            dimension_semantics=("parallel", "arbitrary"),
            vmem_limit_bytes=vmem_limit),
        cost_estimate=cost,
    )(x2, w1_p, b1_2, w2_p, b2_2)

    return out[:M].reshape(B, S, d_model)


def _init_linear(key, in_features, out_features, dtype=jnp.float32):
    # Deterministic init mimicking torch.nn.Linear defaults.
    kw, kb = jax.random.split(key)
    bound = 1.0 / jnp.sqrt(in_features)
    # weight stored as (in_features, out_features) so kernel computes x @ W
    w = jax.random.uniform(kw, (in_features, out_features), dtype,
                           minval=-bound, maxval=bound)
    b = jax.random.uniform(kb, (out_features,), dtype,
                           minval=-bound, maxval=bound)
    return w, b


if __name__ == "__main__":
    # --- case 1: small shapes, single grid step, f32 (direct o_ref accumulation) ---
    k_x, k_w1, k_w2 = jax.random.split(jax.random.PRNGKey(0), 3)
    B, S, d_model, d_ff = 2, 8, 128, 256
    x = jax.random.normal(k_x, (B, S, d_model), jnp.float32)
    w1, b1 = _init_linear(k_w1, d_model, d_ff)   # nn.Linear(d_model, d_ff)
    w2, b2 = _init_linear(k_w2, d_ff, d_model)   # nn.Linear(d_ff, d_model)

    out = jax.block_until_ready(feed_forward(x, w1, b1, w2, b2))
    ref = jnp.maximum(x @ w1 + b1, 0.0) @ w2 + b2
    assert out.shape == (B, S, d_model)
    assert jnp.allclose(out, ref, atol=1e-4, rtol=1e-4)

    # --- case 2: multi-tile grid (row padding + d_ff reduction tiling) -------------
    k_x2, k_w1b, k_w2b = jax.random.split(jax.random.PRNGKey(1), 3)
    B2, S2, dm2, dff2 = 2, 24, 128, 640          # M=48 -> pad 64 rows; d_ff -> pad 768
    x_b = jax.random.normal(k_x2, (B2, S2, dm2), jnp.float32)
    w1b, b1b = _init_linear(k_w1b, dm2, dff2)
    w2b, b2b = _init_linear(k_w2b, dff2, dm2)
    out_b = jax.block_until_ready(
        feed_forward(x_b, w1b, b1b, w2b, b2b, tm=32, tf=256))
    ref_b = jnp.maximum(x_b @ w1b + b1b, 0.0) @ w2b + b2b
    assert jnp.allclose(out_b, ref_b, atol=1e-4, rtol=1e-4)

    # --- case 3: bf16 compute path (full-rate MXU), f32 output, loose tolerance ----
    out_c = jax.block_until_ready(
        feed_forward(x, w1, b1, w2, b2, compute_dtype=jnp.bfloat16))
    assert jnp.allclose(out_c, ref, atol=5e-2, rtol=5e-2)

    print("KERNEL_OK")
</pallas_src>

<mosaic_0001>
module attributes {stable_mosaic.version = 11 : i64} {
  func.func @ffn_kernel_out_acc(%arg0: i32, %arg1: i32, %arg2: memref<16x128xf32, #tpu.memory_space<vmem>>, %arg3: memref<128x256xf32, #tpu.memory_space<vmem>>, %arg4: memref<1x256xf32, #tpu.memory_space<vmem>>, %arg5: memref<256x128xf32, #tpu.memory_space<vmem>>, %arg6: memref<1x128xf32, #tpu.memory_space<vmem>>, %arg7: memref<16x128xf32, #tpu.memory_space<vmem>>) attributes {dimension_semantics = [#tpu.dimension_semantics<parallel>, #tpu.dimension_semantics<arbitrary>], iteration_bounds = array<i64: 1, 1>, scalar_prefetch = 0 : i64, scratch_operands = 0 : i64, tpu.core_type = #tpu.core_type<tc>, window_params = [{transform_indices = @transform_0, window_bounds = array<i64: 16, 128>}, {transform_indices = @transform_1, window_bounds = array<i64: 128, 256>}, {transform_indices = @transform_2, window_bounds = array<i64: 1, 256>}, {transform_indices = @transform_3, window_bounds = array<i64: 256, 128>}, {pipeline_mode = #tpu.pipeline_mode<synchronous>, transform_indices = @transform_4, window_bounds = array<i64: 1, 128>}, {transform_indices = @transform_5, window_bounds = array<i64: 16, 128>}]} {
    %c0_i32 = arith.constant 0 : i32
    %0 = arith.cmpi eq, %arg1, %c0_i32 : i32
    %1 = arith.extui %0 : i1 to i32
    %c0_i32_0 = arith.constant 0 : i32
    %2 = arith.cmpi ne, %1, %c0_i32_0 : i32
    scf.if %2 {
      %c0_14 = arith.constant 0 : index
      %c0_15 = arith.constant 0 : index
      %16 = vector.load %arg6[%c0_14, %c0_15] : memref<1x128xf32, #tpu.memory_space<vmem>>, vector<1x128xf32>
      %17 = vector.shape_cast %16 : vector<1x128xf32> to vector<1x128xf32>
      %18 = vector.broadcast %17 : vector<1x128xf32> to vector<16x128xf32>
      %c0_16 = arith.constant 0 : index
      %c0_17 = arith.constant 0 : index
      %19 = vector.load %arg7[%c0_16, %c0_17] : memref<16x128xf32, #tpu.memory_space<vmem>>, vector<16x128xf32>
      tpu.vector_store %arg7[%c0_16, %c0_17], %18 {strides = array<i32>} : memref<16x128xf32, #tpu.memory_space<vmem>>, vector<16x128xf32>,
    } else {
    }
    %c0 = arith.constant 0 : index
    %c0_1 = arith.constant 0 : index
    %3 = vector.load %arg7[%c0, %c0_1] : memref<16x128xf32, #tpu.memory_space<vmem>>, vector<16x128xf32>
    %c0_2 = arith.constant 0 : index
    %c0_3 = arith.constant 0 : index
    %4 = vector.load %arg2[%c0_2, %c0_3] : memref<16x128xf32, #tpu.memory_space<vmem>>, vector<16x128xf32>
    %c0_4 = arith.constant 0 : index
    %c0_5 = arith.constant 0 : index
    %5 = vector.load %arg3[%c0_4, %c0_5] : memref<128x256xf32, #tpu.memory_space<vmem>>, vector<128x256xf32>
    %cst = arith.constant dense<0.000000e+00> : vector<16x256xf32>
    %6 = tpu.matmul %4, %5, %cst {dimension_numbers = #tpu.dot_dimension_numbers<[1], [0], [0], [1], [0, 0, 1, 1], [], []>} : vector<16x128xf32>, vector<128x256xf32>, vector<16x256xf32> -> vector<16x256xf32>
    %c0_6 = arith.constant 0 : index
    %c0_7 = arith.constant 0 : index
    %7 = vector.load %arg4[%c0_6, %c0_7] : memref<1x256xf32, #tpu.memory_space<vmem>>, vector<1x256xf32>
    %8 = vector.broadcast %7 : vector<1x256xf32> to vector<16x256xf32>
    %9 = arith.addf %6, %8 : vector<16x256xf32>
    %cst_8 = arith.constant 0.000000e+00 : f32
    %10 = vector.broadcast %cst_8 : f32 to vector<16x256xf32>
    %11 = arith.maximumf %9, %10 : vector<16x256xf32>
    %c0_9 = arith.constant 0 : index
    %c0_10 = arith.constant 0 : index
    %12 = vector.load %arg5[%c0_9, %c0_10] : memref<256x128xf32, #tpu.memory_space<vmem>>, vector<256x128xf32>
    %cst_11 = arith.constant dense<0.000000e+00> : vector<16x128xf32>
    %13 = tpu.matmul %11, %12, %cst_11 {dimension_numbers = #tpu.dot_dimension_numbers<[1], [0], [0], [1], [0, 0, 1, 1], [], []>} : vector<16x256xf32>, vector<256x128xf32>, vector<16x128xf32> -> vector<16x128xf32>
    %14 = arith.addf %3, %13 : vector<16x128xf32>
    %c0_12 = arith.constant 0 : index
    %c0_13 = arith.constant 0 : index
    %15 = vector.load %arg7[%c0_12, %c0_13] : memref<16x128xf32, #tpu.memory_space<vmem>>, vector<16x128xf32>
    tpu.vector_store %arg7[%c0_12, %c0_13], %14 {strides = array<i32>} : memref<16x128xf32, #tpu.memory_space<vmem>>, vector<16x128xf32>,
    return
  }
  func.func @transform_0(%arg0: i32, %arg1: i32) -> (i32, i32) {
    %c0_i32 = arith.constant 0 : i32
    %c0_i32_0 = arith.constant 0 : i32
    return %arg0, %c0_i32 : i32, i32
  }
  func.func @transform_1(%arg0: i32, %arg1: i32) -> (i32, i32) {
    %c0_i32 = arith.constant 0 : i32
    %c0_i32_0 = arith.constant 0 : i32
    return %c0_i32, %arg1 : i32, i32
  }
  func.func @transform_2(%arg0: i32, %arg1: i32) -> (i32, i32) {
    %c0_i32 = arith.constant 0 : i32
    %c0_i32_0 = arith.constant 0 : i32
    return %c0_i32, %arg1 : i32, i32
  }
  func.func @transform_3(%arg0: i32, %arg1: i32) -> (i32, i32) {
    %c0_i32 = arith.constant 0 : i32
    %c0_i32_0 = arith.constant 0 : i32
    return %arg1, %c0_i32 : i32, i32
  }
  func.func @transform_4(%arg0: i32, %arg1: i32) -> (i32, i32) {
    %c0_i32 = arith.constant 0 : i32
    %c0_i32_0 = arith.constant 0 : i32
    %c0_i32_1 = arith.constant 0 : i32
    return %c0_i32, %c0_i32_0 : i32, i32
  }
  func.func @transform_5(%arg0: i32, %arg1: i32) -> (i32, i32) {
    %c0_i32 = arith.constant 0 : i32
    %c0_i32_0 = arith.constant 0 : i32
    return %arg0, %c0_i32 : i32, i32
  }
}

</mosaic_0001>

<bundles_post_ra>
// kernel: tpu_custom_call.1
= control target key start
LH: loop header
LB: loop body
LE: loop exit
PB: predicated region body
PF: predicated region fallthrough
CT: control target
= control target key end

     0   :  { %10 = vsyncpa [#allocation3], 0  ;;  %s643_s0 = inlined_call_operand.hbm [shape: f32[16,128], index: 0, kind: input, shape index: {}]   ;;  %s644_s1 = inlined_call_operand.hbm [shape: f32[128,256], index: 1, kind: input, shape index: {}]   ;;  %s645_s2 = inlined_call_operand.vmem [shape: f32[1,256], index: 2, kind: input, shape index: {}]   ;;  %s646_s3 = inlined_call_operand.hbm [shape: f32[256,128], index: 3, kind: input, shape index: {}]   ;;  %s647_s4 = inlined_call_operand.vmem [shape: f32[1,128], index: 4, kind: input, shape index: {}]   ;;  %s648_s5 = inlined_call_operand.hbm [shape: f32[16,128], index: 5, kind: output, shape index: {}]  }
   0x1   :  { %11 = vsyncpa [#allocation6], 0 }
   0x2   :  { %12 = vsyncpa [#allocation4], 0  ;;  %s539_s18 = smov [#allocation5]   ;;  %s445_s22 = scalar_lea.hbm %s644_s1, 4096 }
   0x3   :  { %s30_s19 = sshll.u32 %s539_s18, 4  ;;  %p446_p0 = scmp.ne.s32.totalorder %s644_s1, %s445_s22  ;;  %s31_s19 = int_to_ptr.vmem [resolvable:$true] %s30_s19 }
   0x4   :  { %p449_p1 = scmp.lt.u32.totalorder %s445_s22, %s644_s1 }
   0x6   :  { %p451_p2 = pnand %p449_p1, %p446_p0 }
   0x8   :  { %454 = shalt.err (!%p451_p2)
}
   0x9   :  { %s455_s27 = scalar_lea.vmem %s31_s19, 4096  ;;  %p460_p4 = scmp.lt.s32.totalorder %s31_s19, %s31_s19 }
   0xa   :  { %p456_p3 = scmp.ne.s32.totalorder %s31_s19, %s455_s27  ;;  %p461_p5 = scmp.lt.s32.totalorder %s455_s27, %s455_s27 }
   0xc   :  { %p462_p6 = por %p461_p5, %p460_p4 }
   0xe   :  { %p463_p7 = pnand %p462_p6, %p456_p3 }
  0x10   :  { %466 = shalt.err (!%p463_p7)
}
  0x11   :  { %s540_s28 = smov 256   ;;  %s541_s29 = smov 16  }
  0x12   :  { %36 = dma.hbm_to_vmem [thread:$0]  %s644_s1, 4096, %s31_s19, [#allocation6], %s540_s28, %s540_s28, %s541_s29  }
  0x13   :  { %s542_s7 = smov [#allocation2]   ;;  %s467_s11 = scalar_lea.hbm %s643_s0, 256 }
  0x14   :  { %s18_s8 = sshll.u32 %s542_s7, 4  ;;  %p468_p8 = scmp.ne.s32.totalorder %s643_s0, %s467_s11  ;;  %s19_s8 = int_to_ptr.vmem [resolvable:$true] %s18_s8 }
  0x15   :  { %p471_p9 = scmp.lt.u32.totalorder %s467_s11, %s643_s0 }
  0x17   :  { %p473_p10 = pnand %p471_p9, %p468_p8 }
  0x19   :  { %476 = shalt.err (!%p473_p10)
}
  0x1a   :  { %s477_s16 = scalar_lea.vmem %s19_s8, 256  ;;  %p482_p12 = scmp.lt.s32.totalorder %s19_s8, %s19_s8 }
  0x1b   :  { %p478_p11 = scmp.ne.s32.totalorder %s19_s8, %s477_s16  ;;  %p483_p13 = scmp.lt.s32.totalorder %s477_s16, %s477_s16 }
  0x1d   :  { %p484_p0 = por %p483_p13, %p482_p12 }
  0x1f   :  { %p485_p1 = pnand %p484_p0, %p478_p11 }
  0x21   :  { %488 = shalt.err (!%p485_p1)
}
  0x22   :  { %s543_s1 = smov 128   ;;  %s544_s17 = smov 8  }
  0x23   :  { %24 = dma.hbm_to_vmem [thread:$0]  %s643_s0, 256, %s19_s8, [#allocation3], %s543_s1, %s543_s1, %s544_s17  }
  0x24   :  { %s545_s20 = smov [#allocation7]   ;;  %s489_s24 = scalar_lea.hbm %s646_s3, 4096 }
  0x25   :  { %s44_s21 = sshll.u32 %s545_s20, 4  ;;  %p490_p2 = scmp.ne.s32.totalorder %s646_s3, %s489_s24  ;;  %s45_s21 = int_to_ptr.vmem [resolvable:$true] %s44_s21 }
  0x26   :  { %p493_p3 = scmp.lt.u32.totalorder %s489_s24, %s646_s3 }
  0x28   :  { %p495_p4 = pnand %p493_p3, %p490_p2 }
  0x2a   :  { %498 = shalt.err (!%p495_p4)
}
  0x2b   :  { %s499_s29 = scalar_lea.vmem %s45_s21, 4096  ;;  %p504_p6 = scmp.lt.s32.totalorder %s45_s21, %s45_s21 }
  0x2c   :  { %p500_p5 = scmp.ne.s32.totalorder %s45_s21, %s499_s29  ;;  %p505_p7 = scmp.lt.s32.totalorder %s499_s29, %s499_s29 }
  0x2e   :  { %p506_p8 = por %p505_p7, %p504_p6 }
  0x30   :  { %p507_p9 = pnand %p506_p8, %p500_p5 }
  0x32   :  { %510 = shalt.err (!%p507_p9)
}
  0x33   :  { %50 = dma.hbm_to_vmem [thread:$0]  %s646_s3, 4096, %s45_s21, [#allocation6], %s543_s1, %s543_s1, %s544_s17  }
  0x34   :  { %533 = dma.done.wait [#allocation3], 256  }
  0x35   :  { %534 = vsyncadd [#allocation3], 4294967040 }
  0x36   :  { %535 = dma.done.wait [#allocation6], 8192  }
  0x37   :  { %536 = vsyncadd [#allocation6], 4294959104  ;;  %v546_v0 = vmov 0.0   ;;  %v80_v1 = vld [vmem:[#allocation5 + $0x8] sm:$0xff]  ;;  %v82_v2 = vld [vmem:[#allocation5 + $0x18] sm:$0xff]  ;;  %s547_s8 = smov [#allocation8]  }
  0x38   :  { %187 = vmatprep.mubr.f32.mxu0 %v546_v0  ;;  %v79_v3 = vld [vmem:[#allocation5] sm:$0xff]  ;;  %v372_v4 = vpack.c.bf16 %v82_v2, %v80_v1  ;;  %v81_v5 = vld [vmem:[#allocation5 + $0x10] sm:$0xff]  ;;  %v84_v6 = vld [vmem:[#allocation5 + $0x28] sm:$0xff]  ;;  %s320_s9 = sshll.u32 %s547_s8, 4  ;;  %s321_s9 = int_to_ptr.vmem [resolvable:$true] %s320_s9 }
  0x39   :  { %v86_v7 = vld [vmem:[#allocation5 + $0x38] sm:$0xff]  ;;  %v374_v8 = vpack.c.bf16 %v81_v5, %v79_v3  ;;  %v83_v10 = vld [vmem:[#allocation5 + $0x20] sm:$0xff]  ;;  %v85_v11 = vld [vmem:[#allocation5 + $0x30] sm:$0xff]  ;;  %s511_s10 = scalar_lea.vmem %s321_s9, 256  ;;  %p516_p11 = scmp.lt.s32.totalorder %s321_s9, %s321_s9 }
  0x3a   :  { %v376_v9 = vpack.c.bf16 %v86_v7, %v84_v6  ;;  %v88_v12 = vld [vmem:[#allocation5 + $0x48] sm:$0xff]  ;;  %373 = vmatprep.subr.bf16.mxu0 %v372_v4  ;;  %v90_v13 = vld [vmem:[#allocation5 + $0x58] sm:$0xff]  ;;  %v378_v14 = vpack.c.bf16 %v85_v11, %v83_v10  ;;  %v87_v16 = vld [vmem:[#allocation5 + $0x40] sm:$0xff]  ;;  %p512_p10 = scmp.ne.s32.totalorder %s321_s9, %s511_s10  ;;  %p517_p12 = scmp.lt.s32.totalorder %s511_s10, %s511_s10 }
  0x3b   :  { %375 = vmatpush1.bf16.msra.mxu0 %v374_v8  ;;  %v380_v15 = vpack.c.bf16 %v90_v13, %v88_v12  ;;  %v89_v17 = vld [vmem:[#allocation5 + $0x50] sm:$0xff]  ;;  %v92_v18 = vld [vmem:[#allocation5 + $0x68] sm:$0xff]  ;;  %v94_v19 = vld [vmem:[#allocation5 + $0x78] sm:$0xff] }
  0x3c   :  { %377 = vmatprep.subr.bf16.mxu0 %v376_v9  ;;  %v382_v20 = vpack.c.bf16 %v89_v17, %v87_v16  ;;  %v384_v21 = vpack.c.bf16 %v94_v19, %v92_v18  ;;  %v91_v22 = vld [vmem:[#allocation5 + $0x60] sm:$0xff]  ;;  %v93_v23 = vld [vmem:[#allocation5 + $0x70] sm:$0xff]  ;;  %v96_v24 = vld [vmem:[#allocation5 + $0x88] sm:$0xff]  ;;  %p518_p13 = por %p517_p12, %p516_p11 }
  0x3d   :  { %v98_v25 = vld [vmem:[#allocation5 + $0x98] sm:$0xff]  ;;  %v95_v26 = vld [vmem:[#allocation5 + $0x80] sm:$0xff]  ;;  %v97_v27 = vld [vmem:[#allocation5 + $0x90] sm:$0xff]  ;;  %v386_v30 = vpack.c.bf16 %v93_v23, %v91_v22 }
  0x3e   :  { %v220_v28 = vld [vmem:[#allocation7 + $0x80] sm:$0xff]  ;;  %v221_v29 = vld [vmem:[#allocation7 + $0x88] sm:$0xff]  ;;  %v222_v35 = vld [vmem:[#allocation7 + $0x90] sm:$0xff]  ;;  %v388_v36 = vpack.c.bf16 %v98_v25, %v96_v24  ;;  %v390_v46 = vpack.c.bf16 %v97_v27, %v95_v26  ;;  %p519_p0 = pnand %p518_p13, %p512_p10 }
  0x3f   :  { %379 = vmatpush1.bf16.msra.mxu0 %v378_v14  ;;  %v100_v31 = vld [vmem:[#allocation5 + $0xa8] sm:$0xff]  ;;  %v404_v32 = vpack.c.bf16 %v221_v29, %v220_v28  ;;  %v204_v33 = vld [vmem:[#allocation7] sm:$0xff]  ;;  %v223_v38 = vld [vmem:[#allocation7 + $0x98] sm:$0xff] }
  0x40   :  { %381 = vmatprep.subr.bf16.mxu0 %v380_v15  ;;  %v205_v34 = vld [vmem:[#allocation7 + $0x8] sm:$0xff]  ;;  %v206_v39 = vld [vmem:[#allocation7 + $0x10] sm:$0xff]  ;;  %v207_v40 = vld [vmem:[#allocation7 + $0x18] sm:$0xff]  ;;  %v408_v42 = vpack.c.bf16 %v223_v38, %v222_v35 }
  0x41   :  { %v406_v37 = vpack.c.bf16 %v205_v34, %v204_v33  ;;  %v102_v41 = vld [vmem:[#allocation5 + $0xb8] sm:$0xff]  ;;  %405 = vmatprep.subr.bf16.mxu1 %v404_v32  ;;  %v224_v43 = vld [vmem:[#allocation7 + $0xa0] sm:$0xff]  ;;  %v225_v44 = vld [vmem:[#allocation7 + $0xa8] sm:$0xff]  ;;  %v410_v45 = vpack.c.bf16 %v207_v40, %v206_v39 }
  0x42   :  { %v99_v47 = vld [vmem:[#allocation5 + $0xa0] sm:$0xff]  ;;  %v412_v48 = vpack.c.bf16 %v225_v44, %v224_v43  ;;  %v209_v50 = vld [vmem:[#allocation7 + $0x28] sm:$0xff]  ;;  %v392_v51 = vpack.c.bf16 %v102_v41, %v100_v31  ;;  %v101_v52 = vld [vmem:[#allocation5 + $0xb0] sm:$0xff] }
  0x43   :  { %383 = vmatpush1.bf16.msra.mxu0 %v382_v20  ;;  %407 = vmatpush3.bf16.msra.mxu1 %v406_v37  ;;  %v208_v49 = vld [vmem:[#allocation7 + $0x20] sm:$0xff]  ;;  %v226_v53 = vld [vmem:[#allocation7 + $0xb0] sm:$0xff]  ;;  %v227_v54 = vld [vmem:[#allocation7 + $0xb8] sm:$0xff]  ;;  %v394_v58 = vpack.c.bf16 %v101_v52, %v99_v47 }
  0x44   :  { %385 = vmatprep.subr.bf16.mxu0 %v384_v21  ;;  %409 = vmatprep.subr.bf16.mxu1 %v408_v42  ;;  %v104_v55 = vld [vmem:[#allocation5 + $0xc8] sm:$0xff]  ;;  %v106_v56 = vld [vmem:[#allocation5 + $0xd8] sm:$0xff]  ;;  %v414_v57 = vpack.c.bf16 %v209_v50, %v208_v49  ;;  %v103_v59 = vld [vmem:[#allocation5 + $0xc0] sm:$0xff]  ;;  %v416_v60 = vpack.c.bf16 %v227_v54, %v226_v53 }
  0x45   :  { %v210_v61 = vld [vmem:[#allocation7 + $0x30] sm:$0xff]  ;;  %v211_v62 = vld [vmem:[#allocation7 + $0x38] sm:$0xff]  ;;  %v396_v63 = vpack.c.bf16 %v106_v56, %v104_v55  ;;  %v228_v2 = vld [vmem:[#allocation7 + $0xc0] sm:$0xff] }
  0x46   :  { %v105_v1 = vld [vmem:[#allocation5 + $0xd0] sm:$0xff]  ;;  %v229_v3 = vld [vmem:[#allocation7 + $0xc8] sm:$0xff]  ;;  %v110_v5 = vld [vmem:[#allocation5 + $0xf8] sm:$0xff]  ;;  %v418_v6 = vpack.c.bf16 %v211_v62, %v210_v61 }
  0x47   :  { %387 = vmatpush1.bf16.msra.mxu0 %v386_v30  ;;  %411 = vmatpush3.bf16.msra.mxu1 %v410_v45  ;;  %v108_v4 = vld [vmem:[#allocation5 + $0xe8] sm:$0xff]  ;;  %v398_v7 = vpack.c.bf16 %v105_v1, %v103_v59  ;;  %v107_v8 = vld [vmem:[#allocation5 + $0xe0] sm:$0xff]  ;;  %v420_v9 = vpack.c.bf16 %v229_v3, %v228_v2  ;;  %v109_v13 = vld [vmem:[#allocation5 + $0xf0] sm:$0xff] }
  0x48   :  { %389 = vmatprep.subr.bf16.mxu0 %v388_v36  ;;  %413 = vmatprep.subr.bf16.mxu1 %v412_v48  ;;  %v212_v10 = vld [vmem:[#allocation7 + $0x40] sm:$0xff]  ;;  %v213_v11 = vld [vmem:[#allocation7 + $0x48] sm:$0xff]  ;;  %v400_v12 = vpack.c.bf16 %v110_v5, %v108_v4  ;;  %v230_v14 = vld [vmem:[#allocation7 + $0xd0] sm:$0xff]  ;;  %v402_v17 = vpack.c.bf16 %v109_v13, %v107_v8  ;;  %v113_v36 = vlaneseq }
  0x49   :  { %v231_v15 = vld [vmem:[#allocation7 + $0xd8] sm:$0xff]  ;;  %v422_v16 = vpack.c.bf16 %v213_v11, %v212_v10  ;;  %v214_v19 = vld [vmem:[#allocation7 + $0x50] sm:$0xff]  ;;  %v232_v21 = vld [vmem:[#allocation7 + $0xe0] sm:$0xff] }
  0x4a   :  { %v424_v18 = vpack.c.bf16 %v231_v15, %v230_v14  ;;  %v215_v20 = vld [vmem:[#allocation7 + $0x58] sm:$0xff]  ;;  %v233_v22 = vld [vmem:[#allocation7 + $0xe8] sm:$0xff]  ;;  %v77_v24 = vld [vmem:[#allocation2] sm:$0xff]  ;;  %v114_v37 = vshrl.u32 %v113_v36, 7 }
  0x4b   :  { %391 = vmatpush1.bf16.msra.mxu0 %v390_v46  ;;  %415 = vmatpush3.bf16.msra.mxu1 %v414_v57  ;;  %v426_v23 = vpack.c.bf16 %v215_v20, %v214_v19  ;;  %v428_v25 = vpack.c.bf16 %v233_v22, %v232_v21  ;;  %v78_v26 = vld [vmem:[#allocation2 + $0x8] sm:$0xff]  ;;  %v216_v27 = vld [vmem:[#allocation7 + $0x60] sm:$0xff]  ;;  %v217_v28 = vld [vmem:[#allocation7 + $0x68] sm:$0xff] }
  0x4c   :  { %393 = vmatprep.subr.bf16.mxu0 %v392_v51  ;;  %417 = vmatprep.subr.bf16.mxu1 %v416_v60  ;;  %v430_v29 = vpack.c.bf16 %v217_v28, %v216_v27  ;;  %v234_v30 = vld [vmem:[#allocation7 + $0xf0] sm:$0xff]  ;;  %v235_v31 = vld [vmem:[#allocation7 + $0xf8] sm:$0xff]  ;;  %v115_v38 = vsub.s32 0, %v114_v37  ;;  %v119_v39 = vsub.s32 1, %v114_v37 }
  0x4d   :  { %v432_v32 = vpack.c.bf16 %v235_v31, %v234_v30  ;;  %v218_v33 = vld [vmem:[#allocation7 + $0x70] sm:$0xff]  ;;  %v219_v34 = vld [vmem:[#allocation7 + $0x78] sm:$0xff] }
  0x4e   :  { %v434_v35 = vpack.c.bf16 %v219_v34, %v218_v33  ;;  %v333_v55 = vld [vmem:[%s647_s4] ss:$0 sm:$0xff] }
  0x4f   :  { %395 = vmatpush1.bf16.msra.mxu0 %v394_v58  ;;  %419 = vmatpush3.bf16.msra.mxu1 %v418_v6 }
  0x50   :  { %397 = vmatprep.subr.bf16.mxu0 %v396_v63  ;;  %421 = vmatprep.subr.bf16.mxu1 %v420_v9 }
  0x53   :  { %399 = vmatpush1.bf16.msra.mxu0 %v398_v7  ;;  %423 = vmatpush3.bf16.msra.mxu1 %v422_v16 }
  0x54   :  { %401 = vmatprep.subr.bf16.mxu0 %v400_v12  ;;  %425 = vmatprep.subr.bf16.mxu1 %v424_v18 }
  0x57   :  { %403 = vmatpush1.bf16.msra.mxu0 %v402_v17  ;;  %427 = vmatpush3.bf16.msra.mxu1 %v426_v23 }
  0x58   :  { %429 = vmatprep.subr.bf16.mxu1 %v428_v25 }
  0x5a   :  { %188 = vmatmul.mubr.f32.vlgmr.msra.gmra.mrb[0].mxu0 %v77_v24 }
  0x5b   :  { %193 = vmatprep.mubr.f32.mxu0 %v546_v0  ;;  %431 = vmatpush3.bf16.msra.mxu1 %v430_v29  ;;  %v111_v0 = vld [vmem:[%s645_s2] sm:$0x3] }
  0x5c   :  { %433 = vmatprep.subr.bf16.mxu1 %v432_v32  ;;  %v116_v40 = vrot.slane %v111_v0, %v115_v38  ;;  %v120_v41 = vrot.slane %v111_v0, %v119_v39 }
  0x5e   :  { %194 = vmatmul.mubr.f32.gmra.mrb[2].mxu0 %v78_v26 }
  0x5f   :  { %435 = vmatpush3.bf16.msra.mxu1 %v434_v35 }
 0x12d   :  { %v189_v42 = vpop.f32.mrb[0].mxu0 }
 0x12e   :  { %v190_v43 = vadd.f32 %v189_v42, %v116_v40  ;;  %v191_v44 = vpop.f32.mrb[1].mxu0 }
 0x12f   :  { %v192_v45 = vadd.f32 %v191_v44, %v120_v41 }
 0x130   :  { %v200_v48 = vmax.f32 %v190_v43, 0.0 }
 0x131   :  { %v195_v46 = vpop.f32.mrb[2].mxu0  ;;  %v201_v47 = vmax.f32 %v192_v45, 0.0 }
 0x132   :  { %v196_v49 = vadd.f32 %v195_v46, %v116_v40  ;;  %v197_v50 = vpop.f32.mrb[3].mxu0 }
 0x133   :  { %v198_v51 = vadd.f32 %v197_v50, %v120_v41  ;;  %300 = vmatprep.mubr.f32.mxu1 %v201_v47 }
 0x134   :  { %301 = vmatmul.mubr.f32.vlgmr.msra.gmra.mrb[0].mxu1 %v200_v48  ;;  %v202_v53 = vmax.f32 %v196_v49, 0.0 }
 0x135   :  { %v203_v52 = vmax.f32 %v198_v51, 0.0 }
 0x137   :  { %305 = vmatprep.mubr.f32.mxu1 %v203_v52 }
 0x138   :  { %306 = vmatmul.mubr.f32.gmra.mrb[2].mxu1 %v202_v53 }
 0x207   :  { %v366_v54 = vpop.f32.mrb[0].mxu1 }
 0x208   :  { %v367_v56 = vpop.f32.mrb[1].mxu1 }
 0x209   :  { %v368_v57 = vadd.f32 %v367_v56, %v366_v54 }
 0x20b   :  { %v311_v58 = vadd.f32 %v368_v57, %v333_v55  ;;  %v369_v59 = vpop.f32.mrb[2].mxu1 }
 0x20c   :  { %v370_v60 = vpop.f32.mrb[3].mxu1 }
 0x20d   :  { %313 = vst [vmem:[#allocation8] sm:$0xff] %v311_v58  ;;  %v371_v61 = vadd.f32 %v370_v60, %v369_v59 }
 0x20f   :  { %v312_v62 = vadd.f32 %v371_v61, %v333_v55 }
 0x211   :  { %314 = vst [vmem:[#allocation8 + $0x8] sm:$0xff] %v312_v62 }
 0x212   :  { %522 = shalt.err (!%p519_p0)
}
 0x213   :  { %s523_s12 = scalar_lea.hbm %s648_s5, 256 }
 0x214   :  { %p524_p1 = scmp.ne.s32.totalorder %s648_s5, %s523_s12  ;;  %p527_p2 = scmp.lt.u32.totalorder %s523_s12, %s648_s5 }
 0x216   :  { %p529_p3 = pnand %p527_p2, %p524_p1 }
 0x218   :  { %532 = shalt.err (!%p529_p3)
}
 0x219   :  { %326 = dma.vmem_to_hbm [thread:$0]  %s321_s9, 256, %s648_s5, [#allocation4], %s543_s1, %s543_s1, %s544_s17  }
 0x21a   :  { %537 = dma.done.wait [#allocation4], 256  }
 0x21b   :  { %538 = vsyncadd [#allocation4], 4294967040 }
 0x21c   :  { %330 = vsyncpa [#allocation3], 1 }
 0x21d   :  { %331 = vsyncpa [#allocation6], 1 }
 0x21e   :  { %332 = vsyncpa [#allocation4], 1 }

</bundles_post_ra>
